<compile_context>
chip_gen: v6e
topology: v6e:2x2x1
jax: 0.10.0
libtpu: 0.0.40
codegen_flags: <defaults>
</compile_context>

<pallas_src>
import math
import functools

import jax
import jax.numpy as jnp
from jax.experimental import pallas as pl
from jax.experimental.pallas import tpu as pltpu

TIME_STEPS = 10
NUM_ASSETS = 1
NODES = 32
LANE = 128


def _norm_cdf(z):
    return 0.5 * (1.0 + math.erf(z / math.sqrt(2.0)))


def BS(S0, strike, T, sigma):
    d_plus = (math.log(S0 / strike) + 0.5 * T * sigma ** 2) / (math.sqrt(T) * sigma)
    d_minus = (math.log(S0 / strike) - 0.5 * T * sigma ** 2) / (math.sqrt(T) * sigma)
    return S0 * _norm_cdf(d_plus) - strike * _norm_cdf(d_minus)


def _round_up(n, m):
    return ((n + m - 1) // m) * m


def _default_hidden_dtype():
    """bf16 hidden path only where the VPU/EUP are bf16-capable (v6e/v7x)."""
    try:
        kind = jax.devices()[0].device_kind.lower()
    except Exception:
        return jnp.float32
    if ("v6" in kind) or ("v7" in kind):
        return jnp.bfloat16
    return jnp.float32


def forward_pass_kernel(x_ref, w1p_ref, c_ref, w2_ref, b2_ref, out_ref,
                        *, strike, bs_price, time_steps, hidden_dtype):
    """Lane-dense forward pass over one batch tile.

    x_ref  : [T+1, TB]   price paths (batch tile on lanes), f32
    w1p_ref: [NODES, 1]  Linear1 weight column for the price feature
    c_ref  : [NODES, T]  per-step constant (j/T)*w1_time + b1 (precomputed)
    w2_ref : [NODES, 1]  Linear2 weight
    b2_ref : [1, 1]      Linear2 bias
    out_ref: [1, TB]
    """
    x = x_ref[...]                                    # [T+1, TB] f32
    tb = x.shape[1]
    nodes = w1p_ref.shape[0]

    # Hoist loop-invariant weight broadcasts out of the unrolled loop
    # (JAX does not CSE broadcast_in_dim inside the loop).  The hidden path
    # runs in `hidden_dtype` (bf16 on v6e/v7x halves EUP tanh + pre-act FMA).
    w1p_b = jnp.broadcast_to(w1p_ref[...].astype(hidden_dtype), (nodes, tb))
    c = c_ref[...].astype(hidden_dtype)               # [NODES, T]

    # Per-step price increments, computed once in f32 (exact).
    diffs = x[1:, :] - x[:-1, :]                      # [T, TB]

    # Deferred Linear2 reduction:
    #   profit = sum_j (w2 . h_j + b2) * diff_j
    #          = w2 . (sum_j h_j * diff_j)  +  b2 * (x[T] - x[0])
    # so accumulate acc = sum_j h_j * diff_j at [NODES, TB] (f32) and contract
    # with w2 once after the loop; the b2 term telescopes.  This keeps the
    # cross-sublane reduce and all [1, TB] bookkeeping out of the hot loop.
    acc = jnp.zeros((nodes, tb), jnp.float32)

    # time_steps is a static Python int -> fully unrolled straight-line code.
    for j in range(time_steps):
        price = x[j:j + 1, :].astype(hidden_dtype)                  # [1, TB]
        # Linear1 + tanh: VPU broadcast-FMA + EUP tanh (no MXU, no concat).
        # NOTE: c[:, j:j+1] is a per-step lane-splat of a [NODES, 1] column;
        # kept as-is (it feeds the FMA addend directly).
        h = jnp.tanh(w1p_b * price + c[:, j:j + 1])                 # [NODES, TB]
        # f32 accumulation (profit path stays exact-ish even on the bf16 path).
        acc = acc + h.astype(jnp.float32) * diffs[j:j + 1, :]

    # Epilogue (once per tile): Linear2 contraction + telescoped b2 term.
    w2_b = jnp.broadcast_to(w2_ref[...], (nodes, tb))               # [NODES, TB]
    final_price = x[time_steps:time_steps + 1, :]                   # [1, TB]
    profit = (jnp.sum(acc * w2_b, axis=0, keepdims=True)
              + b2_ref[...] * (final_price - x[0:1, :]))            # [1, TB]

    out = jnp.maximum(final_price - strike, 0.0) - profit - bs_price
    out_ref[...] = out.astype(out_ref.dtype)


def forward_pass(x, params, strike, bs_price, time_steps=TIME_STEPS,
                 batch_tile=8192, hidden_dtype=None):
    """x: [B, time_steps+1, num_assets=1] float32 -> [B, 1] float32."""
    w1, b1, w2, b2 = params          # [2,NODES], [1,NODES], [NODES,1], [1,1]
    B = x.shape[0]
    nodes = w1.shape[1]
    if hidden_dtype is None:
        hidden_dtype = _default_hidden_dtype()

    # Lane-dense layout: batch on the last (lane) axis.
    x2t = jnp.transpose(x[:, :, 0]).astype(jnp.float32)             # [T+1, B]

    # Tile the batch (lane) axis. Large tiles amortize the ~0.35us/step grid
    # overhead; cap at half the batch so the grid has >=2 steps when possible
    # (lets "parallel" shard across both v7x TensorCores).  Per-tile footprint
    # at tb=8192 is only a few MiB, well inside v7x's 64 MiB VMEM.
    if B <= LANE:
        tb = LANE
    else:
        tb = min(int(batch_tile), _round_up(-(-B // 2), LANE))
    b_pad = _round_up(B, tb)
    if b_pad != B:
        x2t = jnp.pad(x2t, ((0, 0), (0, b_pad - B)))
    grid = (b_pad // tb,)

    # Fold Linear1's time feature + bias into a per-step constant (j is static):
    #   c[:, j] = (j / T) * w1_time + b1
    tvec = (jnp.arange(time_steps, dtype=jnp.float32) / time_steps)[:, None]
    cmat = jnp.transpose(tvec * w1[0:1, :] + b1)                    # [NODES, T]
    w1p = jnp.transpose(w1[1:2, :])                                 # [NODES, 1]

    kernel = functools.partial(
        forward_pass_kernel,
        strike=float(strike),
        bs_price=float(bs_price),
        time_steps=int(time_steps),
        hidden_dtype=hidden_dtype,
    )

    out = pl.pallas_call(
        kernel,
        out_shape=jax.ShapeDtypeStruct((1, b_pad), jnp.float32),
        grid=grid,
        in_specs=[
            pl.BlockSpec((time_steps + 1, tb), lambda i: (0, i)),   # x tile
            pl.BlockSpec((nodes, 1), lambda i: (0, 0)),             # w1 (price)
            pl.BlockSpec((nodes, time_steps), lambda i: (0, 0)),    # c_j table
            pl.BlockSpec((nodes, 1), lambda i: (0, 0)),             # w2
            pl.BlockSpec((1, 1), lambda i: (0, 0)),                 # b2
        ],
        out_specs=pl.BlockSpec((1, tb), lambda i: (0, i)),
        compiler_params=pltpu.CompilerParams(
            dimension_semantics=("parallel",),
            vmem_limit_bytes=48 * 1024 * 1024),
    )(x2t, w1p, cmat, w2.astype(jnp.float32), b2.astype(jnp.float32))

    return out[0, :B][:, None]                                      # [B, 1]


def init_params(key, num_assets=NUM_ASSETS, nodes=NODES):
    """Deterministic init matching nn.Linear's U(-1/sqrt(fan_in), 1/sqrt(fan_in))."""
    k1, k2, k3, k4 = jax.random.split(key, 4)
    in1 = num_assets + 1
    bound1 = 1.0 / math.sqrt(in1)
    bound2 = 1.0 / math.sqrt(nodes)
    w1 = jax.random.uniform(k1, (in1, nodes), jnp.float32, -bound1, bound1)
    b1 = jax.random.uniform(k2, (1, nodes), jnp.float32, -bound1, bound1)
    w2 = jax.random.uniform(k3, (nodes, num_assets), jnp.float32, -bound2, bound2)
    b2 = jax.random.uniform(k4, (1, num_assets), jnp.float32, -bound2, bound2)
    return w1, b1, w2, b2


def forward_pass_ref(x, params, strike, bs_price, time_steps=TIME_STEPS):
    """Pure-JAX reference (mirrors the PyTorch forward) for verification."""
    w1, b1, w2, b2 = params
    price = x[:, 0, :]                                              # [B, 1]
    profit = jnp.zeros_like(price)
    for j in range(time_steps):
        t = (j / time_steps) * jnp.ones_like(price)
        state = jnp.concatenate([t, price], axis=1)
        h = jnp.tanh(state @ w1 + b1)
        strategy = h @ w2 + b2
        pricenew = x[:, j + 1, :]
        profit = profit + strategy * (pricenew - price)
        price = pricenew
    return jnp.maximum(price - strike, 0.0) - profit - bs_price


if __name__ == "__main__":
    S0, T, sigma, strike = 1.0, 1.0, 0.2, 1.0
    bs_price = BS(S0, strike, T, sigma)

    key = jax.random.PRNGKey(0)
    kp, kx = jax.random.split(key)
    params = init_params(kp)

    batch = 8
    # Synthetic price paths: [batch, time_steps + 1, num_assets], near S0.
    x = (S0 + 0.1 * jax.random.normal(kx, (batch, TIME_STEPS + 1, NUM_ASSETS))
         ).astype(jnp.float32)

    hidden_dtype = _default_hidden_dtype()
    out = forward_pass(x, params, strike, bs_price, hidden_dtype=hidden_dtype)
    out = jax.block_until_ready(out)

    ref = forward_pass_ref(x.astype(jnp.float32), params, strike, bs_price)
    assert out.shape == (batch, NUM_ASSETS)
    if hidden_dtype == jnp.float32:
        atol = rtol = 1e-5          # exact f32 path (v5e & unknown chips)
    else:
        atol = rtol = 1e-2          # bf16 hidden path (v6e/v7x): ~2-3 digits
    assert jnp.allclose(out, ref, atol=atol, rtol=rtol)

    print("KERNEL_OK")
</pallas_src>

<mosaic_0001>
module attributes {stable_mosaic.version = 11 : i64} {
  func.func @forward_pass_kernel(%arg0: i32, %arg1: memref<11x128xf32, #tpu.memory_space<vmem>>, %arg2: memref<32x1xf32, #tpu.memory_space<vmem>>, %arg3: memref<32x10xf32, #tpu.memory_space<vmem>>, %arg4: memref<32x1xf32, #tpu.memory_space<vmem>>, %arg5: memref<1x1xf32, #tpu.memory_space<vmem>>, %arg6: memref<1x128xf32, #tpu.memory_space<vmem>>) attributes {dimension_semantics = [#tpu.dimension_semantics<parallel>], iteration_bounds = array<i64: 1>, scalar_prefetch = 0 : i64, scratch_operands = 0 : i64, tpu.core_type = #tpu.core_type<tc>, window_params = [{transform_indices = @transform_0, window_bounds = array<i64: 11, 128>}, {pipeline_mode = #tpu.pipeline_mode<synchronous>, transform_indices = @transform_1, window_bounds = array<i64: 32, 1>}, {pipeline_mode = #tpu.pipeline_mode<synchronous>, transform_indices = @transform_2, window_bounds = array<i64: 32, 10>}, {pipeline_mode = #tpu.pipeline_mode<synchronous>, transform_indices = @transform_3, window_bounds = array<i64: 32, 1>}, {pipeline_mode = #tpu.pipeline_mode<synchronous>, transform_indices = @transform_4, window_bounds = array<i64: 1, 1>}, {transform_indices = @transform_5, window_bounds = array<i64: 1, 128>}]} {
    %c0 = arith.constant 0 : index
    %c0_0 = arith.constant 0 : index
    %0 = vector.load %arg1[%c0, %c0_0] : memref<11x128xf32, #tpu.memory_space<vmem>>, vector<11x128xf32>
    %c0_1 = arith.constant 0 : index
    %c0_2 = arith.constant 0 : index
    %1 = vector.load %arg2[%c0_1, %c0_2] : memref<32x1xf32, #tpu.memory_space<vmem>>, vector<32x1xf32>
    %2 = vector.shape_cast %1 : vector<32x1xf32> to vector<32x1xf32>
    %3 = vector.broadcast %2 : vector<32x1xf32> to vector<32x128xf32>
    %c0_3 = arith.constant 0 : index
    %c0_4 = arith.constant 0 : index
    %4 = vector.load %arg3[%c0_3, %c0_4] : memref<32x10xf32, #tpu.memory_space<vmem>>, vector<32x10xf32>
    %5 = vector.extract_strided_slice %0 {offsets = [1, 0], sizes = [10, 128], strides = [1, 1]} : vector<11x128xf32> to vector<10x128xf32>
    %6 = vector.extract_strided_slice %0 {offsets = [0, 0], sizes = [10, 128], strides = [1, 1]} : vector<11x128xf32> to vector<10x128xf32>
    %7 = arith.subf %5, %6 : vector<10x128xf32>
    %cst = arith.constant 0.000000e+00 : f32
    %8 = vector.broadcast %cst : f32 to vector<32x128xf32>
    %9 = vector.extract_strided_slice %0 {offsets = [0, 0], sizes = [1, 128], strides = [1, 1]} : vector<11x128xf32> to vector<1x128xf32>
    %10 = vector.broadcast %9 : vector<1x128xf32> to vector<32x128xf32>
    %11 = arith.mulf %3, %10 : vector<32x128xf32>
    %12 = vector.extract_strided_slice %4 {offsets = [0, 0], sizes = [32, 1], strides = [1, 1]} : vector<32x10xf32> to vector<32x1xf32>
    %13 = vector.broadcast %12 : vector<32x1xf32> to vector<32x128xf32>
    %14 = arith.addf %11, %13 : vector<32x128xf32>
    %15 = math.tanh %14 : vector<32x128xf32>
    %16 = vector.extract_strided_slice %7 {offsets = [0, 0], sizes = [1, 128], strides = [1, 1]} : vector<10x128xf32> to vector<1x128xf32>
    %17 = vector.broadcast %16 : vector<1x128xf32> to vector<32x128xf32>
    %18 = arith.mulf %15, %17 : vector<32x128xf32>
    %19 = arith.addf %8, %18 : vector<32x128xf32>
    %20 = vector.extract_strided_slice %0 {offsets = [1, 0], sizes = [1, 128], strides = [1, 1]} : vector<11x128xf32> to vector<1x128xf32>
    %21 = vector.broadcast %20 : vector<1x128xf32> to vector<32x128xf32>
    %22 = arith.mulf %3, %21 : vector<32x128xf32>
    %23 = vector.extract_strided_slice %4 {offsets = [0, 1], sizes = [32, 1], strides = [1, 1]} : vector<32x10xf32> to vector<32x1xf32>
    %24 = vector.broadcast %23 : vector<32x1xf32> to vector<32x128xf32>
    %25 = arith.addf %22, %24 : vector<32x128xf32>
    %26 = math.tanh %25 : vector<32x128xf32>
    %27 = vector.extract_strided_slice %7 {offsets = [1, 0], sizes = [1, 128], strides = [1, 1]} : vector<10x128xf32> to vector<1x128xf32>
    %28 = vector.broadcast %27 : vector<1x128xf32> to vector<32x128xf32>
    %29 = arith.mulf %26, %28 : vector<32x128xf32>
    %30 = arith.addf %19, %29 : vector<32x128xf32>
    %31 = vector.extract_strided_slice %0 {offsets = [2, 0], sizes = [1, 128], strides = [1, 1]} : vector<11x128xf32> to vector<1x128xf32>
    %32 = vector.broadcast %31 : vector<1x128xf32> to vector<32x128xf32>
    %33 = arith.mulf %3, %32 : vector<32x128xf32>
    %34 = vector.extract_strided_slice %4 {offsets = [0, 2], sizes = [32, 1], strides = [1, 1]} : vector<32x10xf32> to vector<32x1xf32>
    %35 = vector.broadcast %34 : vector<32x1xf32> to vector<32x128xf32>
    %36 = arith.addf %33, %35 : vector<32x128xf32>
    %37 = math.tanh %36 : vector<32x128xf32>
    %38 = vector.extract_strided_slice %7 {offsets = [2, 0], sizes = [1, 128], strides = [1, 1]} : vector<10x128xf32> to vector<1x128xf32>
    %39 = vector.broadcast %38 : vector<1x128xf32> to vector<32x128xf32>
    %40 = arith.mulf %37, %39 : vector<32x128xf32>
    %41 = arith.addf %30, %40 : vector<32x128xf32>
    %42 = vector.extract_strided_slice %0 {offsets = [3, 0], sizes = [1, 128], strides = [1, 1]} : vector<11x128xf32> to vector<1x128xf32>
    %43 = vector.broadcast %42 : vector<1x128xf32> to vector<32x128xf32>
    %44 = arith.mulf %3, %43 : vector<32x128xf32>
    %45 = vector.extract_strided_slice %4 {offsets = [0, 3], sizes = [32, 1], strides = [1, 1]} : vector<32x10xf32> to vector<32x1xf32>
    %46 = vector.broadcast %45 : vector<32x1xf32> to vector<32x128xf32>
    %47 = arith.addf %44, %46 : vector<32x128xf32>
    %48 = math.tanh %47 : vector<32x128xf32>
    %49 = vector.extract_strided_slice %7 {offsets = [3, 0], sizes = [1, 128], strides = [1, 1]} : vector<10x128xf32> to vector<1x128xf32>
    %50 = vector.broadcast %49 : vector<1x128xf32> to vector<32x128xf32>
    %51 = arith.mulf %48, %50 : vector<32x128xf32>
    %52 = arith.addf %41, %51 : vector<32x128xf32>
    %53 = vector.extract_strided_slice %0 {offsets = [4, 0], sizes = [1, 128], strides = [1, 1]} : vector<11x128xf32> to vector<1x128xf32>
    %54 = vector.broadcast %53 : vector<1x128xf32> to vector<32x128xf32>
    %55 = arith.mulf %3, %54 : vector<32x128xf32>
    %56 = vector.extract_strided_slice %4 {offsets = [0, 4], sizes = [32, 1], strides = [1, 1]} : vector<32x10xf32> to vector<32x1xf32>
    %57 = vector.broadcast %56 : vector<32x1xf32> to vector<32x128xf32>
    %58 = arith.addf %55, %57 : vector<32x128xf32>
    %59 = math.tanh %58 : vector<32x128xf32>
    %60 = vector.extract_strided_slice %7 {offsets = [4, 0], sizes = [1, 128], strides = [1, 1]} : vector<10x128xf32> to vector<1x128xf32>
    %61 = vector.broadcast %60 : vector<1x128xf32> to vector<32x128xf32>
    %62 = arith.mulf %59, %61 : vector<32x128xf32>
    %63 = arith.addf %52, %62 : vector<32x128xf32>
    %64 = vector.extract_strided_slice %0 {offsets = [5, 0], sizes = [1, 128], strides = [1, 1]} : vector<11x128xf32> to vector<1x128xf32>
    %65 = vector.broadcast %64 : vector<1x128xf32> to vector<32x128xf32>
    %66 = arith.mulf %3, %65 : vector<32x128xf32>
    %67 = vector.extract_strided_slice %4 {offsets = [0, 5], sizes = [32, 1], strides = [1, 1]} : vector<32x10xf32> to vector<32x1xf32>
    %68 = vector.broadcast %67 : vector<32x1xf32> to vector<32x128xf32>
    %69 = arith.addf %66, %68 : vector<32x128xf32>
    %70 = math.tanh %69 : vector<32x128xf32>
    %71 = vector.extract_strided_slice %7 {offsets = [5, 0], sizes = [1, 128], strides = [1, 1]} : vector<10x128xf32> to vector<1x128xf32>
    %72 = vector.broadcast %71 : vector<1x128xf32> to vector<32x128xf32>
    %73 = arith.mulf %70, %72 : vector<32x128xf32>
    %74 = arith.addf %63, %73 : vector<32x128xf32>
    %75 = vector.extract_strided_slice %0 {offsets = [6, 0], sizes = [1, 128], strides = [1, 1]} : vector<11x128xf32> to vector<1x128xf32>
    %76 = vector.broadcast %75 : vector<1x128xf32> to vector<32x128xf32>
    %77 = arith.mulf %3, %76 : vector<32x128xf32>
    %78 = vector.extract_strided_slice %4 {offsets = [0, 6], sizes = [32, 1], strides = [1, 1]} : vector<32x10xf32> to vector<32x1xf32>
    %79 = vector.broadcast %78 : vector<32x1xf32> to vector<32x128xf32>
    %80 = arith.addf %77, %79 : vector<32x128xf32>
    %81 = math.tanh %80 : vector<32x128xf32>
    %82 = vector.extract_strided_slice %7 {offsets = [6, 0], sizes = [1, 128], strides = [1, 1]} : vector<10x128xf32> to vector<1x128xf32>
    %83 = vector.broadcast %82 : vector<1x128xf32> to vector<32x128xf32>
    %84 = arith.mulf %81, %83 : vector<32x128xf32>
    %85 = arith.addf %74, %84 : vector<32x128xf32>
    %86 = vector.extract_strided_slice %0 {offsets = [7, 0], sizes = [1, 128], strides = [1, 1]} : vector<11x128xf32> to vector<1x128xf32>
    %87 = vector.broadcast %86 : vector<1x128xf32> to vector<32x128xf32>
    %88 = arith.mulf %3, %87 : vector<32x128xf32>
    %89 = vector.extract_strided_slice %4 {offsets = [0, 7], sizes = [32, 1], strides = [1, 1]} : vector<32x10xf32> to vector<32x1xf32>
    %90 = vector.broadcast %89 : vector<32x1xf32> to vector<32x128xf32>
    %91 = arith.addf %88, %90 : vector<32x128xf32>
    %92 = math.tanh %91 : vector<32x128xf32>
    %93 = vector.extract_strided_slice %7 {offsets = [7, 0], sizes = [1, 128], strides = [1, 1]} : vector<10x128xf32> to vector<1x128xf32>
    %94 = vector.broadcast %93 : vector<1x128xf32> to vector<32x128xf32>
    %95 = arith.mulf %92, %94 : vector<32x128xf32>
    %96 = arith.addf %85, %95 : vector<32x128xf32>
    %97 = vector.extract_strided_slice %0 {offsets = [8, 0], sizes = [1, 128], strides = [1, 1]} : vector<11x128xf32> to vector<1x128xf32>
    %98 = vector.broadcast %97 : vector<1x128xf32> to vector<32x128xf32>
    %99 = arith.mulf %3, %98 : vector<32x128xf32>
    %100 = vector.extract_strided_slice %4 {offsets = [0, 8], sizes = [32, 1], strides = [1, 1]} : vector<32x10xf32> to vector<32x1xf32>
    %101 = vector.broadcast %100 : vector<32x1xf32> to vector<32x128xf32>
    %102 = arith.addf %99, %101 : vector<32x128xf32>
    %103 = math.tanh %102 : vector<32x128xf32>
    %104 = vector.extract_strided_slice %7 {offsets = [8, 0], sizes = [1, 128], strides = [1, 1]} : vector<10x128xf32> to vector<1x128xf32>
    %105 = vector.broadcast %104 : vector<1x128xf32> to vector<32x128xf32>
    %106 = arith.mulf %103, %105 : vector<32x128xf32>
    %107 = arith.addf %96, %106 : vector<32x128xf32>
    %108 = vector.extract_strided_slice %0 {offsets = [9, 0], sizes = [1, 128], strides = [1, 1]} : vector<11x128xf32> to vector<1x128xf32>
    %109 = vector.broadcast %108 : vector<1x128xf32> to vector<32x128xf32>
    %110 = arith.mulf %3, %109 : vector<32x128xf32>
    %111 = vector.extract_strided_slice %4 {offsets = [0, 9], sizes = [32, 1], strides = [1, 1]} : vector<32x10xf32> to vector<32x1xf32>
    %112 = vector.broadcast %111 : vector<32x1xf32> to vector<32x128xf32>
    %113 = arith.addf %110, %112 : vector<32x128xf32>
    %114 = math.tanh %113 : vector<32x128xf32>
    %115 = vector.extract_strided_slice %7 {offsets = [9, 0], sizes = [1, 128], strides = [1, 1]} : vector<10x128xf32> to vector<1x128xf32>
    %116 = vector.broadcast %115 : vector<1x128xf32> to vector<32x128xf32>
    %117 = arith.mulf %114, %116 : vector<32x128xf32>
    %118 = arith.addf %107, %117 : vector<32x128xf32>
    %c0_5 = arith.constant 0 : index
    %c0_6 = arith.constant 0 : index
    %119 = vector.load %arg4[%c0_5, %c0_6] : memref<32x1xf32, #tpu.memory_space<vmem>>, vector<32x1xf32>
    %120 = vector.shape_cast %119 : vector<32x1xf32> to vector<32x1xf32>
    %121 = vector.broadcast %120 : vector<32x1xf32> to vector<32x128xf32>
    %122 = vector.extract_strided_slice %0 {offsets = [10, 0], sizes = [1, 128], strides = [1, 1]} : vector<11x128xf32> to vector<1x128xf32>
    %123 = arith.mulf %118, %121 : vector<32x128xf32>
    %cst_7 = arith.constant dense<0.000000e+00> : vector<128xf32>
    %124 = vector.multi_reduction <add>, %123, %cst_7 [0] : vector<32x128xf32> to vector<128xf32>
    %125 = vector.shape_cast %124 : vector<128xf32> to vector<1x128xf32>
    %c0_8 = arith.constant 0 : index
    %c0_9 = arith.constant 0 : index
    %126 = vector.load %arg5[%c0_8, %c0_9] : memref<1x1xf32, #tpu.memory_space<vmem>>, vector<1x1xf32>
    %127 = vector.extract_strided_slice %0 {offsets = [0, 0], sizes = [1, 128], strides = [1, 1]} : vector<11x128xf32> to vector<1x128xf32>
    %128 = arith.subf %122, %127 : vector<1x128xf32>
    %129 = vector.broadcast %126 : vector<1x1xf32> to vector<1x128xf32>
    %130 = arith.mulf %129, %128 : vector<1x128xf32>
    %131 = arith.addf %125, %130 : vector<1x128xf32>
    %cst_10 = arith.constant 1.000000e+00 : f32
    %132 = vector.broadcast %cst_10 : f32 to vector<1x128xf32>
    %133 = arith.subf %122, %132 : vector<1x128xf32>
    %cst_11 = arith.constant 0.000000e+00 : f32
    %134 = vector.broadcast %cst_11 : f32 to vector<1x128xf32>
    %135 = arith.maximumf %133, %134 : vector<1x128xf32>
    %136 = arith.subf %135, %131 : vector<1x128xf32>
    %cst_12 = arith.constant 0.079655677 : f32
    %137 = vector.broadcast %cst_12 : f32 to vector<1x128xf32>
    %138 = arith.subf %136, %137 : vector<1x128xf32>
    %c0_13 = arith.constant 0 : index
    %c0_14 = arith.constant 0 : index
    %139 = vector.load %arg6[%c0_13, %c0_14] : memref<1x128xf32, #tpu.memory_space<vmem>>, vector<1x128xf32>
    tpu.vector_store %arg6[%c0_13, %c0_14], %138 {strides = array<i32>} : memref<1x128xf32, #tpu.memory_space<vmem>>, vector<1x128xf32>,
    return
  }
  func.func @transform_0(%arg0: i32) -> (i32, i32) {
    %c0_i32 = arith.constant 0 : i32
    %c0_i32_0 = arith.constant 0 : i32
    return %c0_i32, %arg0 : i32, i32
  }
  func.func @transform_1(%arg0: i32) -> (i32, i32) {
    %c0_i32 = arith.constant 0 : i32
    %c0_i32_0 = arith.constant 0 : i32
    %c0_i32_1 = arith.constant 0 : i32
    return %c0_i32, %c0_i32_0 : i32, i32
  }
  func.func @transform_2(%arg0: i32) -> (i32, i32) {
    %c0_i32 = arith.constant 0 : i32
    %c0_i32_0 = arith.constant 0 : i32
    %c0_i32_1 = arith.constant 0 : i32
    return %c0_i32, %c0_i32_0 : i32, i32
  }
  func.func @transform_3(%arg0: i32) -> (i32, i32) {
    %c0_i32 = arith.constant 0 : i32
    %c0_i32_0 = arith.constant 0 : i32
    %c0_i32_1 = arith.constant 0 : i32
    return %c0_i32, %c0_i32_0 : i32, i32
  }
  func.func @transform_4(%arg0: i32) -> (i32, i32) {
    %c0_i32 = arith.constant 0 : i32
    %c0_i32_0 = arith.constant 0 : i32
    %c0_i32_1 = arith.constant 0 : i32
    return %c0_i32, %c0_i32_0 : i32, i32
  }
  func.func @transform_5(%arg0: i32) -> (i32, i32) {
    %c0_i32 = arith.constant 0 : i32
    %c0_i32_0 = arith.constant 0 : i32
    return %c0_i32, %arg0 : i32, i32
  }
}

</mosaic_0001>

<bundles_post_ra>
// kernel: tpu_custom_call.1
= control target key start
LH: loop header
LB: loop body
LE: loop exit
PB: predicated region body
PF: predicated region fallthrough
CT: control target
= control target key end

     0   :  { %s1123_s0 = inlined_call_operand.vmem [shape: f32[11,128], index: 0, kind: input, shape index: {}]   ;;  %s1124_s1 = inlined_call_operand.vmem [shape: f32[32,1], index: 1, kind: input, shape index: {}]   ;;  %s1125_s2 = inlined_call_operand.vmem [shape: f32[32,10], index: 2, kind: input, shape index: {}]   ;;  %s1126_s3 = inlined_call_operand.vmem [shape: f32[32,1], index: 3, kind: input, shape index: {}]   ;;  %s1127_s4 = inlined_call_operand.<no memory space> [shape: f32[1,1], index: 4, kind: input, shape index: {}]   ;;  %s1128_s5 = inlined_call_operand.hbm [shape: f32[1,128], index: 5, kind: output, shape index: {}]  }
   0x1   :  { %v10_v0 = vstv %s1127_s4 }
   0x2   :  { %11 = vst [vmem:[#allocation2] sm:$0x1] %v10_v0 }
   0x3   :  { %v27_v1 = vld [vmem:[%s1124_s1 + $0x10] sm:$0xff]  ;;  %v25_v2 = vld [vmem:[%s1124_s1] sm:$0xff]  ;;  %v724_v3 = vmov 0   ;;  %v28_v4 = vld [vmem:[%s1124_s1 + $0x18] sm:$0xff] }
   0x4   :  { %592 = vset.pattern.permute.xlu1 %v724_v3  ;;  %591 = vset.pattern.permute.xlu0 %v724_v3  ;;  %v26_v5 = vld [vmem:[%s1124_s1 + $0x8] sm:$0xff] }
   0x5   :  { %41 = vperm.xlu1 %592, %v27_v1   ;;  %31 = vperm.xlu0 %591, %v25_v2  }
   0x6   :  { %12 = vsyncpa [#allocation4], 0  ;;  %v785_v6 = vld [vmem:[%s1125_s2 + $0x8] sm:$0xff]  ;;  %v790_v7 = vld [vmem:[%s1125_s2] sm:$0xff]  ;;  %v725_v10 = vmov 1   ;;  %v726_v11 = vmov 2   ;;  %v63_v21 = vlaneseq }
   0x7   :  { %v797_v8 = vld [vmem:[%s1125_s2 + $0x18] sm:$0xff]  ;;  %v802_v9 = vld [vmem:[%s1125_s2 + $0x10] sm:$0xff]  ;;  %v727_v12 = vmov 3   ;;  %v728_v13 = vmov 4   ;;  %v729_v14 = vmov 5   ;;  %v730_v15 = vmov 6  }
   0x8   :  { %v731_v16 = vmov 7   ;;  %v732_v17 = vmov 8   ;;  %v733_v18 = vmov 9   ;;  %v508_v19 = vld [vmem:[%s1126_s3 + $0x8] sm:$0xff]  ;;  %v507_v22 = vld [vmem:[%s1126_s3] sm:$0xff]  ;;  %v854_v25 = vshrl.u32 %v63_v21, 7 }
   0x9   :  { %46 = vperm.xlu1 %592, %v28_v4   ;;  %36 = vperm.xlu0 %591, %v26_v5   ;;  %v544_v20 = vld [vmem:[#allocation2] sm:$0x1]  ;;  %v509_v26 = vld [vmem:[%s1126_s3 + $0x10] sm:$0xff]  ;;  %v510_v31 = vld [vmem:[%s1126_s3 + $0x18] sm:$0xff]  ;;  %vm55_vm0 = vcmask 1040384  }
   0xa   :  { %v864_v29 = vsub.s32 0, %v854_v25  ;;  %v869_v30 = vld [vmem:[%s1123_s0] sm:$0xff]  ;;  %v875_v32 = vsub.s32 1, %v854_v25  ;;  %v902_v51 = vsub.s32 2, %v854_v25  ;;  %v233_v4 = vsub.s32 4, %v854_v25 }
   0xb   :  { %v56_v54 = vrot.slane %v869_v30, 7 }
   0xc   :  { %v879_v34 = vrot.slane %v869_v30, %v864_v29  ;;  %v889_v40 = vrot.slane %v869_v30, %v875_v32  ;;  %v907_v57 = vrot.slane %v869_v30, %v902_v51 }
   0xd   :  { %78 = vperm.xlu1 %592, %v785_v6   ;;  %73 = vperm.xlu0 %591, %v790_v7   ;;  %v912_v58 = vsub.f32 %v869_v30, %v56_v54 }
   0xf   :  { %v922_v62 = vrot.slane %v912_v58, %v875_v32  ;;  %v926_v63 = vrot.slane %v912_v58, %v902_v51 }
  0x11   :  { %88 = vperm.xlu1 %592, %v797_v8   ;;  %83 = vperm.xlu0 %591, %v802_v9  }
  0x15   :  { %594 = vset.pattern.permute.xlu1 %v725_v10  ;;  %593 = vset.pattern.permute.xlu0 %v725_v10 }
  0x16   :  { %124 = vperm.xlu1 %594, %v785_v6   ;;  %120 = vperm.xlu0 %593, %v790_v7  }
  0x1a   :  { %128 = vperm.xlu1 %594, %v802_v9   ;;  %132 = vperm.xlu0 %593, %v797_v8  }
  0x1e   :  { %595 = vset.pattern.permute.xlu1 %v726_v11  ;;  %596 = vset.pattern.permute.xlu0 %v726_v11 }
  0x1f   :  { %164 = vperm.xlu1 %595, %v790_v7   ;;  %168 = vperm.xlu0 %596, %v785_v6  }
  0x23   :  { %172 = vperm.xlu1 %595, %v802_v9   ;;  %597 = vset.pattern.permute.xlu0 %v727_v12 }
  0x24   :  { %208 = vperm.xlu0 %597, %v790_v7  }
  0x27   :  { %176 = vperm.xlu1 %595, %v797_v8  }
  0x28   :  { %599 = vset.pattern.permute.xlu0 %v728_v13 }
  0x29   :  { %252 = vperm.xlu0 %599, %v790_v7  }
  0x2b   :  { %598 = vset.pattern.permute.xlu1 %v727_v12 }
  0x2c   :  { %212 = vperm.xlu1 %598, %v785_v6  }
  0x2d   :  { %260 = vperm.xlu0 %599, %v802_v9  }
  0x30   :  { %216 = vperm.xlu1 %598, %v802_v9  }
  0x31   :  { %603 = vset.pattern.permute.xlu0 %v729_v14 }
  0x32   :  { %300 = vperm.xlu0 %603, %v785_v6  }
  0x34   :  { %600 = vset.pattern.permute.xlu1 %v728_v13 }
  0x35   :  { %256 = vperm.xlu1 %600, %v785_v6  }
  0x36   :  { %606 = vset.pattern.permute.xlu0 %v730_v15 }
  0x37   :  { %340 = vperm.xlu0 %606, %v790_v7  }
  0x39   :  { %601 = vset.pattern.permute.xlu1 %v727_v12 }
  0x3a   :  { %220 = vperm.xlu1 %601, %v797_v8  }
  0x3b   :  { %348 = vperm.xlu0 %606, %v802_v9  }
  0x3e   :  { %602 = vset.pattern.permute.xlu1 %v729_v14 }
  0x3f   :  { %296 = vperm.xlu1 %602, %v790_v7   ;;  %610 = vset.pattern.permute.xlu0 %v731_v16 }
  0x40   :  { %388 = vperm.xlu0 %610, %v785_v6  }
  0x43   :  { %604 = vset.pattern.permute.xlu1 %v728_v13  ;;  %v937_v13 = vrot.slane %v869_v30, %v233_v4 }
  0x44   :  { %264 = vperm.xlu1 %604, %v797_v8   ;;  %613 = vset.pattern.permute.xlu0 %v732_v17 }
  0x45   :  { %428 = vperm.xlu0 %613, %v790_v7  }
  0x48   :  { %605 = vset.pattern.permute.xlu1 %v729_v14 }
  0x49   :  { %304 = vperm.xlu1 %605, %v802_v9   ;;  %436 = vperm.xlu0 %613, %v802_v9  }
  0x4d   :  { %607 = vset.pattern.permute.xlu1 %v730_v15  ;;  %617 = vset.pattern.permute.xlu0 %v733_v18 }
  0x4e   :  { %344 = vperm.xlu1 %607, %v785_v6   ;;  %476 = vperm.xlu0 %617, %v785_v6  }
  0x52   :  { %608 = vset.pattern.permute.xlu1 %v729_v14  ;;  %484 = vperm.xlu0 %617, %v797_v8  }
  0x53   :  { %308 = vperm.xlu1 %608, %v797_v8  }
  0x56   :  { %621 = vset.pattern.permute.xlu0 %v724_v3 }
  0x57   :  { %609 = vset.pattern.permute.xlu1 %v731_v16  ;;  %518 = vperm.xlu0 %621, %v508_v19  }
  0x58   :  { %384 = vperm.xlu1 %609, %v790_v7  }
  0x5b   :  { %550 = vperm.xlu0 %621, %v544_v20  }
  0x5c   :  { %611 = vset.pattern.permute.xlu1 %v730_v15 }
  0x5d   :  { %352 = vperm.xlu1 %611, %v797_v8  }
  0x61   :  { %612 = vset.pattern.permute.xlu1 %v731_v16 }
  0x62   :  { %392 = vperm.xlu1 %612, %v802_v9  }
  0x66   :  { %614 = vset.pattern.permute.xlu1 %v732_v17 }
  0x67   :  { %432 = vperm.xlu1 %614, %v785_v6  }
  0x6b   :  { %615 = vset.pattern.permute.xlu1 %v731_v16 }
  0x6c   :  { %396 = vperm.xlu1 %615, %v797_v8  }
  0x70   :  { %616 = vset.pattern.permute.xlu1 %v733_v18 }
  0x71   :  { %472 = vperm.xlu1 %616, %v790_v7  }
  0x75   :  { %618 = vset.pattern.permute.xlu1 %v732_v17 }
  0x76   :  { %440 = vperm.xlu1 %618, %v797_v8  }
  0x7a   :  { %619 = vset.pattern.permute.xlu1 %v733_v18 }
  0x7b   :  { %480 = vperm.xlu1 %619, %v802_v9   ;;  %v189_v9 = vsub.s32 3, %v854_v25 }
  0x7d   :  { %v946_v21 = vrot.slane %v869_v30, %v189_v9 }
  0x7f   :  { %620 = vset.pattern.permute.xlu1 %v724_v3 }
  0x80   :  { %v850_v23 = vpop.permute.xlu1 %41  ;;  %v852_v24 = vpop.permute.xlu0 %31  ;;  %513 = vperm.xlu1 %620, %v507_v22  }
  0x81   :  { %v69_v44 = vmul.f32 %v879_v34, %v850_v23  ;;  %v117_v49 = vmul.f32 %v889_v40, %v850_v23  ;;  %v161_v61 = vmul.f32 %v907_v57, %v850_v23 }
  0x84   :  { %v859_v27 = vpop.permute.xlu1 %46  ;;  %v861_v28 = vpop.permute.xlu0 %36  ;;  %523 = vperm.xlu1 %620, %v509_v26  }
  0x85   :  { %v68_v36 = vmul.f32 %v879_v34, %v861_v28  ;;  %v70_v37 = vmul.f32 %v879_v34, %v859_v27  ;;  %v116_v43 = vmul.f32 %v889_v40, %v861_v28  ;;  %v118_v50 = vmul.f32 %v889_v40, %v859_v27 }
  0x86   :  { %v162_v6 = vmul.f32 %v907_v57, %v859_v27 }
  0x88   :  { %v79_v33 = vpop.permute.xlu1 %78  ;;  %v881_v35 = vpop.permute.xlu0 %73  ;;  %528 = vperm.xlu1 %620, %v510_v31  }
  0x89   :  { %v92_v42 = vadd.f32 %v79_v33, %v68_v36  ;;  %v249_v33 = vmul.f32 %v937_v13, %v850_v23 }
  0x8b   :  { %622 = vtanh.f32 %v92_v42 }
  0x8c   :  { %v89_v38 = vpop.permute.xlu1 %88  ;;  %v84_v39 = vpop.permute.xlu0 %83 }
  0x8d   :  { %v94_v41 = vadd.f32 %v89_v38, %v70_v37  ;;  %v93_v47 = vadd.f32 %v84_v39, %v69_v44  ;;  %v957_v44 = vrot.slane %v912_v58, %v189_v9 }
  0x91   :  { %v125_v45 = vpop.permute.xlu1 %124  ;;  %v895_v46 = vpop.permute.xlu0 %120 }
  0x92   :  { %v136_v48 = vadd.f32 %v125_v45, %v116_v43 }
  0x94   :  { %624 = vtanh.f32 %v136_v48 }
  0x95   :  { %v129_v52 = vpop.permute.xlu1 %128  ;;  %v133_v53 = vpop.permute.xlu0 %132  ;;  %626 = vtanh.f32 %v93_v47 }
  0x96   :  { %v137_v55 = vadd.f32 %v129_v52, %v117_v49  ;;  %v138_v56 = vadd.f32 %v133_v53, %v118_v50  ;;  %628 = vtanh.f32 %v94_v41  ;;  %v205_v41 = vmul.f32 %v946_v21, %v850_v23 }
  0x98   :  { %630 = vtanh.f32 %v137_v55  ;;  %v623_v1 = vpop.eup %622  ;;  %v206_v55 = vmul.f32 %v946_v21, %v859_v27 }
  0x99   :  { %632 = vtanh.f32 %v138_v56  ;;  %v104_v7 = vmul.f32 %v623_v1, %v922_v62  ;;  %v321_v1 = vsub.s32 6, %v854_v25 }
  0x9a   :  { %v914_v59 = vpop.permute.xlu1 %164  ;;  %v916_v60 = vpop.permute.xlu0 %168 }
  0x9e   :  { %v173_v0 = vpop.permute.xlu1 %172 }
  0x9f   :  { %v181_v2 = vadd.f32 %v173_v0, %v161_v61  ;;  %v928_v3 = vpop.permute.xlu0 %208 }
  0xa1   :  { %v625_v5 = vpop.eup %624  ;;  %634 = vtanh.f32 %v181_v2 }
  0xa2   :  { %v148_v8 = vmul.f32 %v625_v5, %v926_v63  ;;  %v177_v10 = vpop.permute.xlu1 %176  ;;  %v627_v11 = vpop.eup %626 }
  0xa3   :  { %v182_v12 = vadd.f32 %v177_v10, %v162_v6  ;;  %v629_v14 = vpop.eup %628  ;;  %v105_v19 = vmul.f32 %v627_v11, %v922_v62  ;;  %v971_v6 = vrot.slane %v912_v58, %v233_v4 }
  0xa4   :  { %v939_v15 = vadd.f32 %v148_v8, %v104_v7  ;;  %v941_v16 = vpop.permute.xlu0 %252  ;;  %v106_v22 = vmul.f32 %v629_v14, %v922_v62  ;;  %v277_v7 = vsub.s32 5, %v854_v25  ;;  %v250_v14 = vmul.f32 %v937_v13, %v859_v27 }
  0xa5   :  { %v631_v17 = vpop.eup %630  ;;  %636 = vtanh.f32 %v182_v12  ;;  %v981_v12 = vrot.slane %v869_v30, %v321_v1 }
  0xa6   :  { %v633_v18 = vpop.eup %632  ;;  %v149_v20 = vmul.f32 %v631_v17, %v926_v63  ;;  %v978_v11 = vrot.slane %v912_v58, %v277_v7 }
  0xa7   :  { %v150_v26 = vmul.f32 %v633_v18, %v926_v63  ;;  %v950_v31 = vpop.permute.xlu1 %212  ;;  %v987_v18 = vrot.slane %v869_v30, %v277_v7  ;;  %v1010_v7 = vld [vmem:[%s1123_s0 + $0x8] sm:$0x7]  ;;  %s734_s0 = smov [#allocation3]  }
  0xa8   :  { %v153_v36 = vadd.f32 %v149_v20, %v105_v19  ;;  %v261_v37 = vpop.permute.xlu0 %260  ;;  %s570_s19 = sshll.u32 %s734_s0, 4  ;;  %s571_s19 = int_to_ptr.vmem [resolvable:$true] %s570_s19 }
  0xa9   :  { %v154_v38 = vadd.f32 %v150_v26, %v106_v22  ;;  %v269_v39 = vadd.f32 %v261_v37, %v249_v33  ;;  %v337_v22 = vmul.f32 %v981_v12, %v850_v23  ;;  %v293_v37 = vmul.f32 %v987_v18, %v850_v23  ;;  %s702_s20 = scalar_lea.vmem %s571_s19, 16  ;;  %s706_s21 = scalar_lea.vmem %s571_s19, 32 }
  0xaa   :  { %p703_p0 = scmp.ne.s32.totalorder %s571_s19, %s702_s20  ;;  %p707_p1 = scmp.lt.s32.totalorder %s571_s19, %s571_s19 }
  0xab   :  { %v217_v42 = vpop.permute.xlu1 %216  ;;  %638 = vtanh.f32 %v269_v39  ;;  %p708_p2 = scmp.lt.s32.totalorder %s706_s21, %s702_s20 }
  0xac   :  { %v225_v43 = vadd.f32 %v217_v42, %v205_v41 }
  0xad   :  { %v963_v53 = vpop.permute.xlu0 %300  ;;  %p709_p3 = por %p708_p2, %p707_p1 }
  0xae   :  { %v635_v45 = vpop.eup %634  ;;  %640 = vtanh.f32 %v225_v43 }
  0xaf   :  { %v193_v47 = vmul.f32 %v635_v45, %v957_v44  ;;  %p710_p4 = pnand %p709_p3, %p703_p0 }
  0xb0   :  { %v960_v48 = vpop.permute.xlu1 %256 }
  0xb1   :  { %v197_v49 = vadd.f32 %v193_v47, %v153_v36 }
  0xb2   :  { %v637_v50 = vpop.eup %636  ;;  %v968_v2 = vpop.permute.xlu0 %340 }
  0xb3   :  { %v194_v52 = vmul.f32 %v637_v50, %v957_v44 }
  0xb5   :  { %v221_v56 = vpop.permute.xlu1 %220  ;;  %v198_v61 = vadd.f32 %v194_v52, %v154_v38 }
  0xb6   :  { %v226_v0 = vadd.f32 %v221_v56, %v206_v55  ;;  %v349_v19 = vpop.permute.xlu0 %348  ;;  %v67_v55 = vmul.f32 %v879_v34, %v852_v24 }
  0xb7   :  { %v357_v36 = vadd.f32 %v349_v19, %v337_v22 }
  0xb8   :  { %642 = vtanh.f32 %v226_v0  ;;  %v639_v5 = vpop.eup %638  ;;  %v115_v0 = vmul.f32 %v889_v40, %v852_v24  ;;  %v91_v40 = vadd.f32 %v881_v35, %v67_v55  ;;  %v247_v35 = vmul.f32 %v937_v13, %v852_v24 }
  0xb9   :  { %v281_v4 = vmul.f32 %v639_v5, %v978_v11 }
  0xba   :  { %v974_v8 = vpop.permute.xlu1 %296  ;;  %v135_v22 = vadd.f32 %v895_v46, %v115_v0  ;;  %v204_v46 = vmul.f32 %v946_v21, %v861_v28 }
  0xbb   :  { %v641_v9 = vpop.eup %640  ;;  %v996_v47 = vpop.permute.xlu0 %388 }
  0xbc   :  { %v237_v10 = vmul.f32 %v641_v9, %v971_v6  ;;  %v160_v9 = vmul.f32 %v907_v57, %v861_v28 }
  0xbe   :  { %v241_v17 = vadd.f32 %v237_v10, %v197_v49  ;;  %v294_v49 = vmul.f32 %v987_v18, %v859_v27 }
  0xbf   :  { %v265_v20 = vpop.permute.xlu1 %264 }
  0xc0   :  { %v270_v26 = vadd.f32 %v265_v20, %v250_v14  ;;  %v285_v33 = vadd.f32 %v281_v4, %v241_v17  ;;  %v1014_v10 = vpop.permute.xlu0 %428  ;;  %v1018_v17 = vrot.slane %v912_v58, %v321_v1  ;;  %v365_v4 = vsub.s32 7, %v854_v25 }
  0xc2   :  { %644 = vtanh.f32 %v270_v26  ;;  %v203_v26 = vmul.f32 %v946_v21, %v852_v24  ;;  %v1032_v1 = vrot.slane %v912_v58, %v365_v4  ;;  %v378_v58 = vrot.slane %v869_v30, %v365_v4 }
  0xc3   :  { %646 = vtanh.f32 %v357_v36  ;;  %v267_v21 = vadd.f32 %v941_v16, %v247_v35  ;;  %v291_v16 = vmul.f32 %v987_v18, %v852_v24 }
  0xc4   :  { %v305_v38 = vpop.permute.xlu1 %304  ;;  %v381_v55 = vmul.f32 %v378_v58, %v850_v23 }
  0xc5   :  { %v643_v39 = vpop.eup %642  ;;  %v313_v41 = vadd.f32 %v305_v38, %v293_v37  ;;  %v180_v37 = vadd.f32 %v916_v60, %v160_v9  ;;  %v338_v38 = vmul.f32 %v981_v12, %v859_v27  ;;  %v57_v9 = vrot.slane %v1010_v7, 7 }
  0xc6   :  { %v238_v42 = vmul.f32 %v643_v39, %v971_v6 }
  0xc7   :  { %648 = vtanh.f32 %v313_v41  ;;  %v223_v41 = vadd.f32 %v928_v3, %v203_v26  ;;  %v58_v26 = vsel %vm55_vm0, %v56_v54, %v57_v9 }
  0xc8   :  { %v242_v43 = vadd.f32 %v238_v42, %v198_v61  ;;  %v159_v61 = vmul.f32 %v907_v57, %v852_v24  ;;  %v1026_v57 = vrot.slane %v1010_v7, %v864_v29  ;;  %v437_v42 = vpop.permute.xlu0 %436 }
  0xc9   :  { %v994_v45 = vpop.permute.xlu1 %344 }
  0xca   :  { %v179_v36 = vadd.f32 %v914_v59, %v159_v61  ;;  %v423_v54 = vmul.f32 %v1026_v57, %v852_v24 }
  0xce   :  { %v309_v50 = vpop.permute.xlu1 %308 }
  0xcf   :  { %v645_v52 = vpop.eup %644  ;;  %v314_v56 = vadd.f32 %v309_v50, %v294_v49 }
  0xd0   :  { %v282_v5 = vmul.f32 %v645_v52, %v978_v11  ;;  %v647_v14 = vpop.eup %646  ;;  %v248_v52 = vmul.f32 %v937_v13, %v861_v28  ;;  %v311_v13 = vadd.f32 %v974_v8, %v291_v16 }
  0xd1   :  { %650 = vtanh.f32 %v314_v56  ;;  %v369_v59 = vmul.f32 %v647_v14, %v1032_v1 }
  0xd2   :  { %v286_v34 = vadd.f32 %v282_v5, %v242_v43  ;;  %652 = vtanh.f32 %v91_v40  ;;  %v425_v43 = vmul.f32 %v1026_v57, %v850_v23  ;;  %v268_v56 = vadd.f32 %v960_v48, %v248_v52 }
  0xd3   :  { %v385_v19 = vpop.permute.xlu1 %384  ;;  %654 = vtanh.f32 %v135_v22  ;;  %v336_v48 = vmul.f32 %v981_v12, %v861_v28  ;;  %v379_v22 = vmul.f32 %v378_v58, %v852_v24 }
  0xd4   :  { %v649_v20 = vpop.eup %648  ;;  %656 = vtanh.f32 %v179_v36  ;;  %v445_v3 = vadd.f32 %v437_v42, %v425_v43 }
  0xd5   :  { %v325_v25 = vmul.f32 %v649_v20, %v1018_v17  ;;  %658 = vtanh.f32 %v180_v37  ;;  %v356_v8 = vadd.f32 %v994_v45, %v336_v48  ;;  %v399_v37 = vadd.f32 %v385_v19, %v379_v22 }
  0xd7   :  { %v329_v39 = vadd.f32 %v325_v25, %v285_v33  ;;  %v224_v33 = vadd.f32 %v950_v31, %v204_v46  ;;  %v292_v31 = vmul.f32 %v987_v18, %v861_v28  ;;  %v335_v18 = vmul.f32 %v981_v12, %v852_v24  ;;  %v477_v46 = vpop.permute.xlu0 %476 }
  0xd8   :  { %v353_v60 = vpop.permute.xlu1 %352  ;;  %v382_v12 = vmul.f32 %v378_v58, %v859_v27 }
  0xd9   :  { %v358_v49 = vadd.f32 %v353_v60, %v338_v38  ;;  %v1046_v50 = vadd.f32 %v369_v59, %v329_v39  ;;  %v312_v4 = vadd.f32 %v963_v53, %v292_v31  ;;  %v355_v35 = vadd.f32 %v968_v2, %v335_v18 }
  0xda   :  { %v380_v53 = vmul.f32 %v378_v58, %v861_v28  ;;  %v1073_v38 = vsub.f32 %v1010_v7, %v58_v26  ;;  %v424_v2 = vmul.f32 %v1026_v57, %v861_v28  ;;  %v466_v60 = vrot.slane %v1010_v7, %v875_v32 }
  0xdb   :  { %660 = vtanh.f32 %v358_v49 }
  0xdc   :  { %662 = vtanh.f32 %v223_v41  ;;  %v400_v58 = vadd.f32 %v996_v47, %v380_v53  ;;  %v468_v16 = vmul.f32 %v466_v60, %v861_v28  ;;  %v454_v48 = vrot.slane %v1073_v38, %v875_v32 }
  0xdd   :  { %664 = vtanh.f32 %v267_v21  ;;  %v393_v0 = vpop.permute.xlu1 %392 }
  0xde   :  { %v651_v5 = vpop.eup %650  ;;  %666 = vtanh.f32 %v224_v33  ;;  %v401_v61 = vadd.f32 %v393_v0, %v381_v55  ;;  %v443_v33 = vadd.f32 %v1014_v10, %v423_v54  ;;  %v485_v0 = vpop.permute.xlu0 %484 }
  0xdf   :  { %668 = vtanh.f32 %v445_v3  ;;  %v326_v14 = vmul.f32 %v651_v5, %v1018_v17  ;;  %v653_v36 = vpop.eup %652  ;;  %v467_v3 = vmul.f32 %v466_v60, %v852_v24  ;;  %v470_v5 = vmul.f32 %v466_v60, %v859_v27 }
  0xe0   :  { %670 = vtanh.f32 %v401_v61  ;;  %v655_v25 = vpop.eup %654  ;;  %v103_v39 = vmul.f32 %v653_v36, %v922_v62 }
  0xe1   :  { %672 = vtanh.f32 %v268_v56  ;;  %v330_v40 = vadd.f32 %v326_v14, %v286_v34  ;;  %v657_v34 = vpop.eup %656  ;;  %v147_v41 = vmul.f32 %v655_v25, %v926_v63  ;;  %v1089_v63 = vrot.slane %v1073_v38, %v864_v29 }
  0xe2   :  { %v433_v20 = vpop.permute.xlu1 %432  ;;  %674 = vtanh.f32 %v311_v13  ;;  %v659_v45 = vpop.eup %658  ;;  %v191_v24 = vmul.f32 %v657_v34, %v957_v44  ;;  %v488_v14 = vadd.f32 %v477_v46, %v468_v16 }
  0xe3   :  { %676 = vtanh.f32 %v312_v4  ;;  %v444_v62 = vadd.f32 %v433_v20, %v424_v2  ;;  %v151_v56 = vadd.f32 %v147_v41, %v103_v39  ;;  %v192_v13 = vmul.f32 %v659_v45, %v957_v44 }
  0xe4   :  { %678 = vtanh.f32 %v356_v8  ;;  %v490_v4 = vadd.f32 %v485_v0, %v470_v5  ;;  %v426_v8 = vmul.f32 %v1026_v57, %v859_v27 }
  0xe5   :  { %680 = vtanh.f32 %v355_v35  ;;  %v196_v36 = vadd.f32 %v192_v13, %v939_v15  ;;  %v195_v35 = vadd.f32 %v191_v24, %v151_v56  ;;  %v498_v56 = vrot.slane %v1073_v38, %v902_v51 }
  0xe6   :  { %682 = vtanh.f32 %v399_v37 }
  0xe7   :  { %v397_v19 = vpop.permute.xlu1 %396 }
  0xe8   :  { %v661_v59 = vpop.eup %660  ;;  %v402_v42 = vadd.f32 %v397_v19, %v382_v12  ;;  %v469_v12 = vmul.f32 %v466_v60, %v850_v23 }
  0xe9   :  { %v663_v43 = vpop.eup %662  ;;  %v370_v21 = vmul.f32 %v661_v59, %v1032_v1 }
  0xea   :  { %v665_v49 = vpop.eup %664  ;;  %684 = vtanh.f32 %v402_v42  ;;  %v235_v18 = vmul.f32 %v663_v43, %v971_v6 }
  0xeb   :  { %v667_v52 = vpop.eup %666  ;;  %v374_v47 = vadd.f32 %v370_v21, %v330_v40  ;;  %686 = vtanh.f32 %v400_v58  ;;  %v279_v25 = vmul.f32 %v665_v49, %v978_v11 }
  0xec   :  { %v669_v55 = vpop.eup %668  ;;  %v473_v31 = vpop.permute.xlu1 %472  ;;  %688 = vtanh.f32 %v444_v62  ;;  %v236_v28 = vmul.f32 %v667_v52, %v971_v6  ;;  %v239_v46 = vadd.f32 %v235_v18, %v195_v35 }
  0xed   :  { %v671_v61 = vpop.eup %670  ;;  %v487_v10 = vadd.f32 %v473_v31, %v467_v3  ;;  %690 = vtanh.f32 %v443_v33  ;;  %v457_v22 = vmul.f32 %v669_v55, %v454_v48 }
  0xee   :  { %v673_v9 = vpop.eup %672  ;;  %v413_v40 = vmul.f32 %v671_v61, %v1089_v63  ;;  %v240_v6 = vadd.f32 %v236_v28, %v196_v36  ;;  %v283_v45 = vadd.f32 %v279_v25, %v239_v46  ;;  %v545_v46 = vrot.slane %v869_v30, 6 }
  0xef   :  { %692 = vtanh.f32 %v487_v10  ;;  %v675_v20 = vpop.eup %674  ;;  %v280_v32 = vmul.f32 %v673_v9, %v978_v11 }
  0xf0   :  { %v417_v44 = vadd.f32 %v413_v40, %v1046_v50  ;;  %694 = vtanh.f32 %v488_v14  ;;  %v677_v53 = vpop.eup %676  ;;  %v323_v27 = vmul.f32 %v675_v20, %v1018_v17  ;;  %v519_v20 = vpop.permute.xlu0 %518 }
  0xf1   :  { %v441_v26 = vpop.permute.xlu1 %440  ;;  %696 = vtanh.f32 %v490_v4  ;;  %v679_v57 = vpop.eup %678  ;;  %v284_v15 = vadd.f32 %v280_v32, %v240_v6  ;;  %v324_v19 = vmul.f32 %v677_v53, %v1018_v17 }
  0xf2   :  { %v446_v37 = vadd.f32 %v441_v26, %v426_v8  ;;  %v461_v34 = vadd.f32 %v457_v22, %v417_v44  ;;  %v681_v50 = vpop.eup %680  ;;  %v368_v59 = vmul.f32 %v679_v57, %v1032_v1  ;;  %v327_v41 = vadd.f32 %v323_v27, %v283_v45 }
  0xf3   :  { %v683_v39 = vpop.eup %682  ;;  %v328_v43 = vadd.f32 %v324_v19, %v284_v15  ;;  %v367_v62 = vmul.f32 %v681_v50, %v1032_v1  ;;  %v578_v45 = vadd.f32 -1.0, %v1010_v7 }
  0xf4   :  { %698 = vtanh.f32 %v446_v37  ;;  %v411_v23 = vmul.f32 %v683_v39, %v1089_v63  ;;  %v551_v27 = vpop.permute.xlu0 %550 }
  0xf5   :  { %v372_v33 = vadd.f32 %v368_v59, %v328_v43  ;;  %v371_v52 = vadd.f32 %v367_v62, %v327_v41  ;;  %v556_v15 = vrot.slane %v551_v27, %v864_v29 }
  0xf6   :  { %v481_v54 = vpop.permute.xlu1 %480 }
  0xf7   :  { %v685_v2 = vpop.eup %684  ;;  %v489_v11 = vadd.f32 %v481_v54, %v469_v12  ;;  %v415_v16 = vadd.f32 %v411_v23, %v371_v52  ;;  %v547_v12 = vsub.f32 %v1010_v7, %v545_v46 }
  0xf8   :  { %v414_v58 = vmul.f32 %v685_v2, %v1089_v63  ;;  %v687_v42 = vpop.eup %686  ;;  %v560_v2 = vmax.f32 %v578_v45, 0.0 }
  0xf9   :  { %700 = vtanh.f32 %v489_v11  ;;  %v689_v60 = vpop.eup %688  ;;  %v412_v17 = vmul.f32 %v687_v42, %v1089_v63  ;;  %v557_v54 = vmul.f32 %v556_v15, %v547_v12 }
  0xfa   :  { %v418_v21 = vadd.f32 %v414_v58, %v374_v47  ;;  %v691_v49 = vpop.eup %690  ;;  %v456_v55 = vmul.f32 %v689_v60, %v454_v48 }
  0xfb   :  { %v416_v5 = vadd.f32 %v412_v17, %v372_v33  ;;  %v455_v31 = vmul.f32 %v691_v49, %v454_v48  ;;  %v514_v10 = vpop.permute.xlu1 %513 }
  0xfc   :  { %v693_v3 = vpop.eup %692 }
  0xfd   :  { %v695_v0 = vpop.eup %694  ;;  %v499_v61 = vmul.f32 %v693_v3, %v498_v56  ;;  %v460_v24 = vadd.f32 %v456_v55, %v416_v5  ;;  %v459_v47 = vadd.f32 %v455_v31, %v415_v16 }
  0xfe   :  { %v697_v1 = vpop.eup %696  ;;  %v500_v14 = vmul.f32 %v695_v0, %v498_v56 }
  0xff   :  { %v503_v40 = vadd.f32 %v499_v61, %v459_v47  ;;  %v502_v4 = vmul.f32 %v697_v1, %v498_v56  ;;  %v524_v8 = vpop.permute.xlu1 %523 }
 0x100   :  { %v504_v63 = vadd.f32 %v500_v14, %v460_v24 }
 0x101   :  { %v699_v13 = vpop.eup %698  ;;  %v531_v38 = vmul.f32 %v514_v10, %v503_v40 }
 0x102   :  { %v458_v9 = vmul.f32 %v699_v13, %v454_v48  ;;  %v532_v22 = vmul.f32 %v519_v20, %v504_v63 }
 0x103   :  { %v529_v35 = vpop.permute.xlu1 %528 }
 0x104   :  { %v462_v28 = vadd.f32 %v458_v9, %v418_v21  ;;  %v535_v36 = vadd.f32 %v532_v22, %v531_v38 }
 0x106   :  { %v701_v18 = vpop.eup %700  ;;  %v506_v51 = vadd.f32 %v502_v4, %v462_v28 }
 0x107   :  { %v501_v44 = vmul.f32 %v701_v18, %v498_v56 }
 0x108   :  { %v534_v37 = vmul.f32 %v529_v35, %v506_v51 }
 0x109   :  { %v505_v26 = vadd.f32 %v501_v44, %v461_v34 }
 0x10b   :  { %v533_v32 = vmul.f32 %v524_v8, %v505_v26 }
 0x10d   :  { %v536_v25 = vadd.f32 %v535_v36, %v533_v32 }
 0x10f   :  { %v537_v53 = vadd.f32 %v536_v25, %v534_v37 }
 0x111   :  { %v538_v48 = vrot.slane %v537_v53, 4 }
 0x113   :  { %v539_v6 = vadd.f32 %v538_v48, %v537_v53 }
 0x115   :  { %v540_v57 = vrot.slane %v539_v6, 2 }
 0x117   :  { %v541_v50 = vadd.f32 %v540_v57, %v539_v6 }
 0x119   :  { %v542_v34 = vrot.slane %v541_v50, 1 }
 0x11b   :  { %v543_v39 = vadd.f32 %v542_v34, %v541_v50 }
 0x11d   :  { %v558_v11 = vadd.f32 %v557_v54, %v543_v39 }
 0x11f   :  { %v561_v19 = vsub.f32 %v560_v2, %v558_v11 }
 0x121   :  { %v579_v59 = vadd.f32 -0.07965568, %v561_v19 }
 0x123   :  { %563 = vst [vmem:[#allocation3 - $0x2] sm:$0x4] %v579_v59 }
 0x124   :  { %713 = shalt.err (!%p710_p4)
}
 0x125   :  { %573 = dma.vmem_to_hbm [thread:$0]  %s571_s19, 16, %s1128_s5, [#allocation4]  }
 0x126   :  { %722 = dma.done.wait [#allocation4], 16  }
 0x127   :  { %723 = vsyncadd [#allocation4], 4294967280 }
 0x128   :  { %577 = vsyncpa [#allocation4], 1 }

</bundles_post_ra>
